<compile_context>
chip_gen: v7x
topology: tpu7x:2x2x1
jax: 0.10.0
libtpu: 0.0.40
codegen_flags: <defaults>
</compile_context>

<pallas_src>
import jax
import jax.numpy as jnp
from jax.experimental import pallas as pl
from jax.experimental.pallas import tpu as pltpu

INPUT_DIM = 21
HIDDEN_DIM = 100
OUTPUT_DIM = 166

# Padded (MXU/lane-friendly) sizes used inside the kernel.
PAD_K = 32      # input features  21  -> 32  (block last-dim == full array dim)
PAD_H = 128     # hidden units    100 -> 128
PAD_N = 256     # output features 166 -> 256
MAX_TB = 1024   # upper bound on batch tile (x+out double-buffered ~1.2 MiB)


def mlp_kernel(x_ref, w1_ref, b1_ref, w2_ref, b2_ref, o_ref):
    # x_ref: (TB, PAD_K) bf16, w1_ref: (PAD_K, PAD_H) bf16, b1_ref: (1, PAD_H) f32
    # w2_ref: (PAD_H, PAD_N) bf16, b2_ref: (1, PAD_N) f32, o_ref: (TB, PAD_N) bf16
    h = jnp.dot(x_ref[...], w1_ref[...],
                preferred_element_type=jnp.float32)          # MXU, f32 acc
    h = jnp.maximum(h + b1_ref[...], 0.0)                    # bias + ReLU in f32
    y = jnp.dot(h.astype(jnp.bfloat16), w2_ref[...],
                preferred_element_type=jnp.float32)          # MXU, f32 acc
    o_ref[...] = jax.nn.sigmoid(y + b2_ref[...]).astype(o_ref.dtype)


def _round_up(v, m):
    return (v + m - 1) // m * m


def _pad2d(a, rows, cols):
    return jnp.pad(a, ((0, rows - a.shape[0]), (0, cols - a.shape[1])))


def _choose_tb(B):
    """Pick a batch tile: big tiles for large B, minimal padding + >=2 grid
    steps for small/medium B (keeps both v7x TensorCores busy)."""
    if B <= 16:
        return 16
    n_steps = max(2, pl.cdiv(B, MAX_TB))
    return min(MAX_TB, _round_up(pl.cdiv(B, n_steps), 16))


def prepare_params(w1, b1, w2, b2):
    """Zero-pad parameters to lane-aligned shapes; matmul operands -> bf16."""
    w1_p = _pad2d(w1, PAD_K, PAD_H).astype(jnp.bfloat16)      # (32, 128)
    b1_p = _pad2d(b1, 1, PAD_H).astype(jnp.float32)           # (1, 128)
    w2_p = _pad2d(w2, PAD_H, PAD_N).astype(jnp.bfloat16)      # (128, 256)
    b2_p = _pad2d(b2, 1, PAD_N).astype(jnp.float32)           # (1, 256)
    return w1_p, b1_p, w2_p, b2_p


@jax.jit
def mlp_forward(x, w1_p, b1_p, w2_p, b2_p):
    B = x.shape[0]
    TB = _choose_tb(B)
    B_pad = pl.cdiv(B, TB) * TB

    # Zero-pad batch and K; cast matmul operand to bf16 (fused under jit).
    x_p = _pad2d(x, B_pad, PAD_K).astype(jnp.bfloat16)

    grid = (B_pad // TB,)

    flops = 2 * B_pad * (PAD_K * PAD_H + PAD_H * PAD_N)
    bytes_accessed = (
        x_p.size * 2                              # bf16 x in
        + (PAD_K * PAD_H + PAD_H * PAD_N) * 2     # bf16 weights
        + (PAD_H + PAD_N) * 4                     # f32 biases
        + B_pad * PAD_N * 2                       # bf16 out
    )

    out_p = pl.pallas_call(
        mlp_kernel,
        out_shape=jax.ShapeDtypeStruct((B_pad, PAD_N), jnp.bfloat16),
        grid=grid,
        in_specs=[
            pl.BlockSpec((TB, PAD_K), lambda i: (i, 0)),      # x: tiled over batch
            pl.BlockSpec((PAD_K, PAD_H), lambda i: (0, 0)),   # w1: resident
            pl.BlockSpec((1, PAD_H), lambda i: (0, 0)),       # b1: resident
            pl.BlockSpec((PAD_H, PAD_N), lambda i: (0, 0)),   # w2: resident
            pl.BlockSpec((1, PAD_N), lambda i: (0, 0)),       # b2: resident
        ],
        out_specs=pl.BlockSpec((TB, PAD_N), lambda i: (i, 0)),
        compiler_params=pltpu.CompilerParams(
            dimension_semantics=("parallel",),                # megacore batch split
        ),
        cost_estimate=pl.CostEstimate(
            flops=flops,
            transcendentals=B_pad * PAD_N,                    # sigmoid exp
            bytes_accessed=bytes_accessed,
        ),
    )(x_p, w1_p, b1_p, w2_p, b2_p)

    # Drop batch padding and padded output lanes (which hold sigmoid(0)=0.5).
    return out_p[:B, :OUTPUT_DIM]


def init_params(key):
    k1, k2, k3, k4 = jax.random.split(key, 4)

    # layer_1: kaiming_uniform_(nonlinearity='relu') as in the reference module:
    #   bound = sqrt(2) * sqrt(3 / fan_in), fan_in = INPUT_DIM
    bound1_w = jnp.sqrt(2.0) * jnp.sqrt(3.0 / INPUT_DIM)
    w1 = jax.random.uniform(k1, (INPUT_DIM, HIDDEN_DIM), jnp.float32,
                            minval=-bound1_w, maxval=bound1_w)
    # layer_1 bias keeps torch default: U(-1/sqrt(fan_in), 1/sqrt(fan_in))
    bound1_b = 1.0 / jnp.sqrt(INPUT_DIM)
    b1 = jax.random.uniform(k2, (1, HIDDEN_DIM), jnp.float32,
                            minval=-bound1_b, maxval=bound1_b)

    # layer_2: torch default init, U(-1/sqrt(fan_in), 1/sqrt(fan_in))
    bound2 = 1.0 / jnp.sqrt(HIDDEN_DIM)
    w2 = jax.random.uniform(k3, (HIDDEN_DIM, OUTPUT_DIM), jnp.float32,
                            minval=-bound2, maxval=bound2)
    b2 = jax.random.uniform(k4, (1, OUTPUT_DIM), jnp.float32,
                            minval=-bound2, maxval=bound2)
    return w1, b1, w2, b2


if __name__ == "__main__":
    key = jax.random.PRNGKey(0)
    key_x, key_p = jax.random.split(key)

    # Small but ragged batch: with TB=112 this gives a 2-step grid (both v7x
    # TensorCores active) and only 24 padded rows.
    B = 200
    x = jax.random.normal(key_x, (B, INPUT_DIM), jnp.float32)
    w1, b1, w2, b2 = init_params(key_p)

    w1_p, b1_p, w2_p, b2_p = prepare_params(w1, b1, w2, b2)

    out = mlp_forward(x, w1_p, b1_p, w2_p, b2_p)
    jax.block_until_ready(out)

    # Sanity check against plain-JAX f32 reference (relaxed tol: bf16 MXU
    # operands and bf16 output; sigmoid output in [0,1] so abs err ~4e-3).
    ref = jax.nn.sigmoid(jnp.maximum(x @ w1 + b1, 0.0) @ w2 + b2)
    assert out.shape == (B, OUTPUT_DIM)
    assert jnp.allclose(out.astype(jnp.float32), ref, atol=2e-2, rtol=2e-2), \
        "mismatch vs reference"

    print("KERNEL_OK")
</pallas_src>

<mosaic_0001>
module attributes {stable_mosaic.version = 11 : i64} {
  func.func @mlp_kernel(%arg0: i32, %arg1: memref<112x32xbf16, #tpu.memory_space<vmem>>, %arg2: memref<32x128xbf16, #tpu.memory_space<vmem>>, %arg3: memref<1x128xf32, #tpu.memory_space<vmem>>, %arg4: memref<128x256xbf16, #tpu.memory_space<vmem>>, %arg5: memref<1x256xf32, #tpu.memory_space<vmem>>, %arg6: memref<112x256xbf16, #tpu.memory_space<vmem>>) attributes {dimension_semantics = [#tpu.dimension_semantics<parallel>], iteration_bounds = array<i64: 2>, scalar_prefetch = 0 : i64, scratch_operands = 0 : i64, tpu.core_type = #tpu.core_type<tc>, window_params = [{transform_indices = @transform_0, window_bounds = array<i64: 112, 32>}, {pipeline_mode = #tpu.pipeline_mode<synchronous>, transform_indices = @transform_1, window_bounds = array<i64: 32, 128>}, {pipeline_mode = #tpu.pipeline_mode<synchronous>, transform_indices = @transform_2, window_bounds = array<i64: 1, 128>}, {pipeline_mode = #tpu.pipeline_mode<synchronous>, transform_indices = @transform_3, window_bounds = array<i64: 128, 256>}, {pipeline_mode = #tpu.pipeline_mode<synchronous>, transform_indices = @transform_4, window_bounds = array<i64: 1, 256>}, {transform_indices = @transform_5, window_bounds = array<i64: 112, 256>}]} {
    %c0 = arith.constant 0 : index
    %c0_0 = arith.constant 0 : index
    %0 = vector.load %arg1[%c0, %c0_0] : memref<112x32xbf16, #tpu.memory_space<vmem>>, vector<112x32xbf16>
    %c0_1 = arith.constant 0 : index
    %c0_2 = arith.constant 0 : index
    %1 = vector.load %arg2[%c0_1, %c0_2] : memref<32x128xbf16, #tpu.memory_space<vmem>>, vector<32x128xbf16>
    %cst = arith.constant dense<0.000000e+00> : vector<112x128xf32>
    %2 = tpu.matmul %0, %1, %cst {dimension_numbers = #tpu.dot_dimension_numbers<[1], [0], [0], [1], [0, 0, 1, 1], [], []>} : vector<112x32xbf16>, vector<32x128xbf16>, vector<112x128xf32> -> vector<112x128xf32>
    %c0_3 = arith.constant 0 : index
    %c0_4 = arith.constant 0 : index
    %3 = vector.load %arg3[%c0_3, %c0_4] : memref<1x128xf32, #tpu.memory_space<vmem>>, vector<1x128xf32>
    %4 = vector.broadcast %3 : vector<1x128xf32> to vector<112x128xf32>
    %5 = arith.addf %2, %4 : vector<112x128xf32>
    %cst_5 = arith.constant 0.000000e+00 : f32
    %6 = vector.broadcast %cst_5 : f32 to vector<112x128xf32>
    %7 = arith.maximumf %5, %6 : vector<112x128xf32>
    %8 = arith.truncf %7 : vector<112x128xf32> to vector<112x128xbf16>
    %c0_6 = arith.constant 0 : index
    %c0_7 = arith.constant 0 : index
    %9 = vector.load %arg4[%c0_6, %c0_7] : memref<128x256xbf16, #tpu.memory_space<vmem>>, vector<128x256xbf16>
    %cst_8 = arith.constant dense<0.000000e+00> : vector<112x256xf32>
    %10 = tpu.matmul %8, %9, %cst_8 {dimension_numbers = #tpu.dot_dimension_numbers<[1], [0], [0], [1], [0, 0, 1, 1], [], []>} : vector<112x128xbf16>, vector<128x256xbf16>, vector<112x256xf32> -> vector<112x256xf32>
    %c0_9 = arith.constant 0 : index
    %c0_10 = arith.constant 0 : index
    %11 = vector.load %arg5[%c0_9, %c0_10] : memref<1x256xf32, #tpu.memory_space<vmem>>, vector<1x256xf32>
    %12 = vector.broadcast %11 : vector<1x256xf32> to vector<112x256xf32>
    %13 = arith.addf %10, %12 : vector<112x256xf32>
    %14 = arith.negf %13 : vector<112x256xf32>
    %15 = math.exp %14 : vector<112x256xf32>
    %cst_11 = arith.constant 1.000000e+00 : f32
    %16 = vector.broadcast %cst_11 : f32 to vector<112x256xf32>
    %17 = arith.addf %16, %15 : vector<112x256xf32>
    %18 = arith.divf %16, %17 : vector<112x256xf32>
    %19 = arith.truncf %18 : vector<112x256xf32> to vector<112x256xbf16>
    %c0_12 = arith.constant 0 : index
    %c0_13 = arith.constant 0 : index
    %20 = vector.load %arg6[%c0_12, %c0_13] : memref<112x256xbf16, #tpu.memory_space<vmem>>, vector<112x256xbf16>
    tpu.vector_store %arg6[%c0_12, %c0_13], %19 {strides = array<i32>} : memref<112x256xbf16, #tpu.memory_space<vmem>>, vector<112x256xbf16>,
    return
  }
  func.func @transform_0(%arg0: i32) -> (i32, i32) {
    %c0_i32 = arith.constant 0 : i32
    %c0_i32_0 = arith.constant 0 : i32
    return %arg0, %c0_i32 : i32, i32
  }
  func.func @transform_1(%arg0: i32) -> (i32, i32) {
    %c0_i32 = arith.constant 0 : i32
    %c0_i32_0 = arith.constant 0 : i32
    %c0_i32_1 = arith.constant 0 : i32
    return %c0_i32, %c0_i32_0 : i32, i32
  }
  func.func @transform_2(%arg0: i32) -> (i32, i32) {
    %c0_i32 = arith.constant 0 : i32
    %c0_i32_0 = arith.constant 0 : i32
    %c0_i32_1 = arith.constant 0 : i32
    return %c0_i32, %c0_i32_0 : i32, i32
  }
  func.func @transform_3(%arg0: i32) -> (i32, i32) {
    %c0_i32 = arith.constant 0 : i32
    %c0_i32_0 = arith.constant 0 : i32
    %c0_i32_1 = arith.constant 0 : i32
    return %c0_i32, %c0_i32_0 : i32, i32
  }
  func.func @transform_4(%arg0: i32) -> (i32, i32) {
    %c0_i32 = arith.constant 0 : i32
    %c0_i32_0 = arith.constant 0 : i32
    %c0_i32_1 = arith.constant 0 : i32
    return %c0_i32, %c0_i32_0 : i32, i32
  }
  func.func @transform_5(%arg0: i32) -> (i32, i32) {
    %c0_i32 = arith.constant 0 : i32
    %c0_i32_0 = arith.constant 0 : i32
    return %arg0, %c0_i32 : i32, i32
  }
}

</mosaic_0001>

<bundles_post_ra>
// kernel: mlp_forward.1
= control target key start
LH: loop header
LB: loop body
LE: loop exit
PB: predicated region body
PF: predicated region fallthrough
CT: control target
= control target key end

     0   :  { %s1324_s18 = smov 0   ;;  %s1508_s0 = inlined_call_operand.vmem [shape: bf16[224,32], index: 0, kind: input, shape index: {}]   ;;  %s1509_s1 = inlined_call_operand.vmem [shape: bf16[32,128], index: 1, kind: input, shape index: {}]   ;;  %s1510_s2 = inlined_call_operand.vmem [shape: f32[1,128], index: 2, kind: input, shape index: {}]   ;;  %s1511_s3 = inlined_call_operand.vmem [shape: bf16[128,256], index: 3, kind: input, shape index: {}]   ;;  %s1512_s4 = inlined_call_operand.vmem [shape: f32[1,256], index: 4, kind: input, shape index: {}]   ;;  %s1513_s5 = inlined_call_operand.vmem [shape: bf16[224,256], index: 5, kind: output, shape index: {}]  }
   0x1 LB: > { %s970_s19 = sadd.s32 4294967295, %s1289_s18   ;;  %p974_p0 = scmp.ge.s32.totalorder %s1289_s18, 1  ;;  %s1289_s18 = sphi %s1324_s18, %s15_s18  }
   0x2   : > { %p188_p1 = scmp.lt.s32.totalorder %s1289_s18, 3 }
   0x4   : > { %p189_p2 = pnand %p974_p0, %p188_p1 }
   0x5   : > { %v1138_v0 = vld [vmem:[%s1509_s1] sm:$0xff] (!%p189_p2)   ;;  %v1291_v1 = vmov (!%p189_p2), 0.0   ;;  %v1139_v2 = vld [vmem:[%s1509_s1 + $0x8] sm:$0xff] (!%p189_p2)   ;;  %vm1292_vm0 = vmmov (!%p189_p2), 0   ;;  %s217_s24 = smul.u32 (!%p189_p2), 14, %s970_s19  ;;  %vm303_vm1 = vcmask (!%p189_p2), 261120  }
   0x6   : > { %192 = sbr.rel (%p189_p2) target bundleno = 534 (0x216), region = 40  ;;  %1079 = vmatprep.subr.bf16.mxu0 (!%p189_p2), %v1291_v1  ;;  %1083 = vmatprep.mubr.msk.bf16.mxu0 (!%p189_p2), %vm1292_vm0, %v1291_v1  ;;  %v1149_v3 = vld [vmem:[%s1511_s3 + $0x4] ss:$8 sps:$4 sm:$0xff] (!%p189_p2)   ;;  %v1147_v4 = vld [vmem:[%s1511_s3] ss:$8 sps:$4 sm:$0xff] (!%p189_p2)   ;;  %v1293_v26 = vmov (!%p189_p2), 0  }
   0x7   : > { %1080 = vmatpush3.bf16.msra.mxu0 (!%p189_p2), %v1138_v0  ;;  %p218_p3 = scmp.lt.s32.totalorder (!%p189_p2), %s217_s24, 27  ;;  %v1152_v5 = vld [vmem:[%s1511_s3 + $0x14] ss:$8 sps:$4 sm:$0xff] (!%p189_p2)   ;;  %1111 = vmatprep.subr.bf16.mxu1 (!%p189_p2), %v1149_v3  ;;  %v1150_v6 = vld [vmem:[%s1511_s3 + $0x10] ss:$8 sps:$4 sm:$0xff] (!%p189_p2)  }
   0x8   : > { %1081 = vmatprep.subr.bf16.mxu0 (!%p189_p2), %v1291_v1  ;;  %1119 = vmatpush1.bf16.msra.mxu1 (!%p189_p2), %v1147_v4  ;;  %v1155_v7 = vld [vmem:[%s1511_s3 + $0x24] ss:$8 sps:$4 sm:$0xff] (!%p189_p2)   ;;  %v1153_v9 = vld [vmem:[%s1511_s3 + $0x20] ss:$8 sps:$4 sm:$0xff] (!%p189_p2)   ;;  %v1158_v10 = vld [vmem:[%s1511_s3 + $0x34] ss:$8 sps:$4 sm:$0xff] (!%p189_p2)  }
   0x9   : > { %1112 = vmatprep.subr.bf16.mxu1 (!%p189_p2), %v1152_v5  ;;  %v1156_v11 = vld [vmem:[%s1511_s3 + $0x30] ss:$8 sps:$4 sm:$0xff] (!%p189_p2)   ;;  %v1161_v13 = vld [vmem:[%s1511_s3 + $0x44] ss:$8 sps:$4 sm:$0xff] (!%p189_p2)   ;;  %v1159_v14 = vld [vmem:[%s1511_s3 + $0x40] ss:$8 sps:$4 sm:$0xff] (!%p189_p2)   ;;  %585 = vmatprep.mubr.bf16.mxu1 (!%p189_p2), %v1293_v26 }
   0xa   : > { %v1164_v15 = vld [vmem:[%s1511_s3 + $0x54] ss:$8 sps:$4 sm:$0xff] (!%p189_p2)   ;;  %v1162_v17 = vld [vmem:[%s1511_s3 + $0x50] ss:$8 sps:$4 sm:$0xff] (!%p189_p2)   ;;  %v1167_v22 = vld [vmem:[%s1511_s3 + $0x64] ss:$8 sps:$4 sm:$0xff] (!%p189_p2)  }
   0xb   : > { %1082 = vmatpush3.bf16.msra.mxu0 (!%p189_p2), %v1139_v2  ;;  %v1165_v23 = vld [vmem:[%s1511_s3 + $0x60] ss:$8 sps:$4 sm:$0xff] (!%p189_p2)   ;;  %v1170_v24 = vld [vmem:[%s1511_s3 + $0x74] ss:$8 sps:$4 sm:$0xff] (!%p189_p2)   ;;  %v1168_v25 = vld [vmem:[%s1511_s3 + $0x70] ss:$8 sps:$4 sm:$0xff] (!%p189_p2)  }
   0xc   : > { %543 = vmatprep.subr.bf16.mxu0 (!%p189_p2), %v1149_v3  ;;  %1120 = vmatpush1.bf16.msra.mxu1 (!%p189_p2), %v1150_v6  ;;  %v1429_v27 = vld [vmem:[%s1510_s2] ss:$0 sm:$0xff] (!%p189_p2) }
   0xd   : > { %s1515_s24 = smov (!%p218_p3, %s217_s24), 27  ;;  %1113 = vmatprep.subr.bf16.mxu1 %v1155_v7 }
   0xe   : > { %s975_s6 = sshll.u32 %s1515_s24, 2  ;;  %s1055_s17 = sshll.u32 %s1515_s24, 3 }
   0xf   : > { %s1360_s11 = scalar_lea.vmem %s1508_s0, %s975_s6  ;;  %s1477_s24 = scalar_lea.vmem %s1513_s5, %s1055_s17 }
  0x10   : > { %v1140_v8 = vld [vmem:[%s1360_s11] sm:$0xff]   ;;  %1121 = vmatpush1.bf16.msra.mxu1 %v1153_v9  ;;  %v1141_v12 = vld [vmem:[%s1360_s11 + $0x8] sm:$0xff]   ;;  %v1142_v16 = vld [vmem:[%s1360_s11 + $0x10] sm:$0xff]  }
  0x11   : > { %1084 = vmatmul.mubr.msk.bf16.vlgmr.msra.gmra.mrb[0].mxu0 %vm303_vm1, %v1140_v8  ;;  %1114 = vmatprep.subr.bf16.mxu1 %v1158_v10  ;;  %v1143_v18 = vld [vmem:[%s1360_s11 + $0x18] sm:$0xff]   ;;  %v1144_v19 = vld [vmem:[%s1360_s11 + $0x20] sm:$0xff]   ;;  %v1145_v20 = vld [vmem:[%s1360_s11 + $0x28] sm:$0xff]  }
  0x12   : > { %1087 = vmatprep.mubr.msk.bf16.mxu0 %vm1292_vm0, %v1291_v1  ;;  %544 = vmatpush1.bf16.msra.mxu0 %v1147_v4  ;;  %v1146_v21 = vld [vmem:[%s1360_s11 + $0x30] sm:$0xff]  }
  0x13   : > { %545 = vmatprep.subr.bf16.mxu0 %v1152_v5 }
  0x14   : > { %1122 = vmatpush1.bf16.msra.mxu1 %v1156_v11 }
  0x15   : > { %1115 = vmatprep.subr.bf16.mxu1 %v1161_v13 }
  0x16   : > { %546 = vmatpush1.bf16.msra.mxu0 %v1150_v6 }
  0x17   : > { %547 = vmatprep.subr.bf16.mxu0 %v1155_v7 }
  0x18   : > { %1123 = vmatpush1.bf16.msra.mxu1 %v1159_v14 }
  0x19   : > { %1088 = vmatmul.mubr.msk.bf16.gmra.mrb[4].mxu0 %vm303_vm1, %v1141_v12  ;;  %1116 = vmatprep.subr.bf16.mxu1 %v1164_v15 }
  0x1a   : > { %1091 = vmatprep.mubr.msk.bf16.mxu0 %vm1292_vm0, %v1291_v1  ;;  %548 = vmatpush1.bf16.msra.mxu0 %v1153_v9 }
  0x1b   : > { %549 = vmatprep.subr.bf16.mxu0 %v1158_v10 }
  0x1c   : > { %1124 = vmatpush1.bf16.msra.mxu1 %v1162_v17 }
  0x1d   : > { %1117 = vmatprep.subr.bf16.mxu1 %v1167_v22 }
  0x1e   : > { %550 = vmatpush1.bf16.msra.mxu0 %v1156_v11 }
  0x1f   : > { %551 = vmatprep.subr.bf16.mxu0 %v1161_v13 }
  0x20   : > { %1125 = vmatpush1.bf16.msra.mxu1 %v1165_v23 }
  0x21   : > { %1092 = vmatmul.mubr.msk.bf16.gmra.mrb[8].mxu0 %vm303_vm1, %v1142_v16  ;;  %1118 = vmatprep.subr.bf16.mxu1 %v1170_v24 }
  0x22   : > { %1095 = vmatprep.mubr.msk.bf16.mxu0 %vm1292_vm0, %v1291_v1  ;;  %552 = vmatpush1.bf16.msra.mxu0 %v1159_v14 }
  0x23   : > { %553 = vmatprep.subr.bf16.mxu0 %v1164_v15 }
  0x24   : > { %1126 = vmatpush1.bf16.msra.mxu1 %v1168_v25 }
  0x26   : > { %554 = vmatpush1.bf16.msra.mxu0 %v1162_v17 }
  0x27   : > { %555 = vmatprep.subr.bf16.mxu0 %v1167_v22 }
  0x29   : > { %1096 = vmatmul.mubr.msk.bf16.gmra.mrb[12].mxu0 %vm303_vm1, %v1143_v18 }
  0x2a   : > { %1099 = vmatprep.mubr.msk.bf16.mxu0 %vm1292_vm0, %v1291_v1  ;;  %556 = vmatpush1.bf16.msra.mxu0 %v1165_v23 }
  0x2b   : > { %557 = vmatprep.subr.bf16.mxu0 %v1170_v24 }
  0x2e   : > { %558 = vmatpush1.bf16.msra.mxu0 %v1168_v25 }
  0x31   : > { %1100 = vmatmul.mubr.msk.bf16.gmra.mrb[16].mxu0 %vm303_vm1, %v1144_v19 }
  0x32   : > { %1103 = vmatprep.mubr.msk.bf16.mxu0 %vm1292_vm0, %v1291_v1 }
  0x39   : > { %1104 = vmatmul.mubr.msk.bf16.gmra.mrb[20].mxu0 %vm303_vm1, %v1145_v20 }
  0x3a   : > { %1107 = vmatprep.mubr.msk.bf16.mxu0 %vm1292_vm0, %v1291_v1 }
  0x41   : > { %1108 = vmatmul.mubr.msk.bf16.gmra.mrb[24].mxu0 %vm303_vm1, %v1146_v21 }
  0x42   : > { %575 = vmatprep.mubr.bf16.mxu0 %v1293_v26 }
  0xe4   : > { %v359_v28 = vpop.f32.mrb[0].mxu0 }
  0xe5   : > { %v360_v29 = vadd.f32 %v1429_v27, %v359_v28  ;;  %v1085_v30 = vpop.f32.mrb[1].mxu0 }
  0xe6   : > { %v362_v31 = vpop.f32.mrb[2].mxu0 }
  0xe7   : > { %v363_v32 = vadd.f32 %v1429_v27, %v362_v31  ;;  %v1086_v33 = vpop.f32.mrb[3].mxu0  ;;  %v414_v34 = vmax.f32 %v360_v29, 0.0  ;;  %v453_v29 = vlaneseq }
  0xe9   : > { %v415_v35 = vmax.f32 %v363_v32, 0.0  ;;  %v454_v30 = vshrl.u32 %v453_v29, 7  ;;  %v451_v32 = vld [vmem:[%s1512_s4] sm:$0x3] }
  0xeb   : > { %v428_v36 = vpack.c.bf16 %v415_v35, %v414_v34  ;;  %v455_v31 = vsub.s32 0, %v454_v30  ;;  %v459_v33 = vsub.s32 1, %v454_v30 }
  0xec   : > { %v367_v37 = vpop.f32.mrb[4].mxu0 }
  0xed   : > { %v368_v38 = vadd.f32 %v1429_v27, %v367_v37  ;;  %v1089_v39 = vpop.f32.mrb[5].mxu0  ;;  %576 = vmatmul.mubr.bf16.vlgmr.msra.gmra.mrb[28].mxu0 %v428_v36  ;;  %v1453_v34 = vrot.slane %v451_v32, %v455_v31  ;;  %v1455_v35 = vrot.slane %v451_v32, %v459_v33 }
  0xee   : > { %v370_v40 = vpop.f32.mrb[6].mxu0 }
  0xef   : > { %v371_v41 = vadd.f32 %v1429_v27, %v370_v40  ;;  %v1090_v42 = vpop.f32.mrb[7].mxu0  ;;  %v416_v43 = vmax.f32 %v368_v38, 0.0 }
  0xf1   : > { %v417_v44 = vmax.f32 %v371_v41, 0.0 }
  0xf3   : > { %v429_v45 = vpack.c.bf16 %v417_v44, %v416_v43 }
  0xf4   : > { %v375_v46 = vpop.f32.mrb[8].mxu0 }
  0xf5   : > { %v376_v47 = vadd.f32 %v1429_v27, %v375_v46  ;;  %v1093_v48 = vpop.f32.mrb[9].mxu0  ;;  %586 = vmatmul.mubr.bf16.vlgmr.msra.gmra.mrb[0].mxu1 %v429_v45 }
  0xf6   : > { %v378_v49 = vpop.f32.mrb[10].mxu0  ;;  %595 = vmatprep.mubr.bf16.mxu1 %v1293_v26 }
  0xf7   : > { %v379_v50 = vadd.f32 %v1429_v27, %v378_v49  ;;  %v1094_v51 = vpop.f32.mrb[11].mxu0  ;;  %v418_v52 = vmax.f32 %v376_v47, 0.0 }
  0xf9   : > { %v419_v53 = vmax.f32 %v379_v50, 0.0 }
  0xfb   : > { %v430_v54 = vpack.c.bf16 %v419_v53, %v418_v52 }
  0xfc   : > { %v383_v55 = vpop.f32.mrb[12].mxu0 }
  0xfd   : > { %v384_v56 = vadd.f32 %v1429_v27, %v383_v55  ;;  %v1097_v57 = vpop.f32.mrb[13].mxu0  ;;  %596 = vmatmul.mubr.bf16.gmra.mrb[4].mxu1 %v430_v54 }
  0xfe   : > { %v386_v58 = vpop.f32.mrb[14].mxu0  ;;  %605 = vmatprep.mubr.bf16.mxu1 %v1293_v26 }
  0xff   : > { %v387_v59 = vadd.f32 %v1429_v27, %v386_v58  ;;  %v1098_v60 = vpop.f32.mrb[15].mxu0  ;;  %v420_v61 = vmax.f32 %v384_v56, 0.0 }
 0x101   : > { %v421_v62 = vmax.f32 %v387_v59, 0.0 }
 0x103   : > { %v431_v63 = vpack.c.bf16 %v421_v62, %v420_v61 }
 0x104   : > { %v391_v0 = vpop.f32.mrb[16].mxu0 }
 0x105   : > { %v392_v1 = vadd.f32 %v1429_v27, %v391_v0  ;;  %v1101_v2 = vpop.f32.mrb[17].mxu0  ;;  %606 = vmatmul.mubr.bf16.gmra.mrb[8].mxu1 %v431_v63 }
 0x106   : > { %v394_v3 = vpop.f32.mrb[18].mxu0  ;;  %615 = vmatprep.mubr.bf16.mxu1 %v1293_v26 }
 0x107   : > { %v395_v4 = vadd.f32 %v1429_v27, %v394_v3  ;;  %v1102_v5 = vpop.f32.mrb[19].mxu0  ;;  %v422_v6 = vmax.f32 %v392_v1, 0.0 }
 0x109   : > { %v423_v7 = vmax.f32 %v395_v4, 0.0 }
 0x10b   : > { %v432_v8 = vpack.c.bf16 %v423_v7, %v422_v6 }
 0x10c   : > { %v399_v9 = vpop.f32.mrb[20].mxu0 }
 0x10d   : > { %v400_v10 = vadd.f32 %v1429_v27, %v399_v9  ;;  %v1105_v11 = vpop.f32.mrb[21].mxu0  ;;  %616 = vmatmul.mubr.bf16.gmra.mrb[12].mxu1 %v432_v8 }
 0x10e   : > { %v402_v12 = vpop.f32.mrb[22].mxu0  ;;  %625 = vmatprep.mubr.bf16.mxu1 %v1293_v26 }
 0x10f   : > { %v403_v13 = vadd.f32 %v1429_v27, %v402_v12  ;;  %v1106_v14 = vpop.f32.mrb[23].mxu0  ;;  %v424_v15 = vmax.f32 %v400_v10, 0.0 }
 0x111   : > { %v425_v16 = vmax.f32 %v403_v13, 0.0 }
 0x113   : > { %v433_v17 = vpack.c.bf16 %v425_v16, %v424_v15 }
 0x114   : > { %v407_v18 = vpop.f32.mrb[24].mxu0 }
 0x115   : > { %v408_v19 = vadd.f32 %v1429_v27, %v407_v18  ;;  %v1109_v20 = vpop.f32.mrb[25].mxu0  ;;  %626 = vmatmul.mubr.bf16.gmra.mrb[16].mxu1 %v433_v17 }
 0x116   : > { %v410_v21 = vpop.f32.mrb[26].mxu0  ;;  %635 = vmatprep.mubr.bf16.mxu1 %v1293_v26 }
 0x117   : > { %v411_v22 = vadd.f32 %v1429_v27, %v410_v21  ;;  %v1110_v23 = vpop.f32.mrb[27].mxu0  ;;  %v426_v24 = vmax.f32 %v408_v19, 0.0 }
 0x119   : > { %v427_v25 = vmax.f32 %v411_v22, 0.0 }
 0x11b   : > { %v434_v28 = vpack.c.bf16 %v427_v25, %v426_v24 }
 0x11d   : > { %636 = vmatmul.mubr.bf16.gmra.mrb[20].mxu1 %v434_v28 }
 0x1c0   : > { %v577_v26 = vpop.f32.mrb[28].mxu0 }
 0x1c1   : > { %v578_v27 = vadd.f32 %v577_v26, %v1453_v34  ;;  %v579_v36 = vpop.f32.mrb[29].mxu0 }
 0x1c2   : > { %v580_v37 = vadd.f32 %v579_v36, %v1455_v35  ;;  %v581_v38 = vpop.f32.mrb[30].mxu0 }
 0x1c3   : > { %v1011_v39 = vmul.f32 -1.442695, %v578_v27  ;;  %v582_v40 = vadd.f32 %v581_v38, %v1453_v34  ;;  %v583_v41 = vpop.f32.mrb[31].mxu0 }
 0x1c4   : > { %v1012_v42 = vmul.f32 -1.442695, %v580_v37  ;;  %v584_v43 = vadd.f32 %v583_v41, %v1455_v35 }
 0x1c5   : > { %1171 = vpow2.f32 %v1011_v39  ;;  %v1013_v44 = vmul.f32 -1.442695, %v582_v40 }
 0x1c6   : > { %1173 = vpow2.f32 %v1012_v42  ;;  %v1014_v45 = vmul.f32 -1.442695, %v584_v43 }
 0x1c7   : > { %1175 = vpow2.f32 %v1013_v44 }
 0x1c8   : > { %1177 = vpow2.f32 %v1014_v45  ;;  %v587_v46 = vpop.f32.mrb[0].mxu1 }
 0x1c9   : > { %v588_v47 = vadd.f32 %v587_v46, %v1453_v34  ;;  %v589_v48 = vpop.f32.mrb[1].mxu1 }
 0x1ca   : > { %v590_v49 = vadd.f32 %v589_v48, %v1455_v35  ;;  %v591_v50 = vpop.f32.mrb[2].mxu1 }
 0x1cb   : > { %v1015_v51 = vmul.f32 -1.442695, %v588_v47  ;;  %v592_v52 = vadd.f32 %v591_v50, %v1453_v34  ;;  %v593_v53 = vpop.f32.mrb[3].mxu1 }
 0x1cc   : > { %v1016_v54 = vmul.f32 -1.442695, %v590_v49  ;;  %v594_v55 = vadd.f32 %v593_v53, %v1455_v35 }
 0x1cd   : > { %1179 = vpow2.f32 %v1015_v51  ;;  %v1017_v56 = vmul.f32 -1.442695, %v592_v52 }
 0x1ce   : > { %1181 = vpow2.f32 %v1016_v54  ;;  %v1018_v57 = vmul.f32 -1.442695, %v594_v55 }
 0x1cf   : > { %v1172_v58 = vpop.eup %1171  ;;  %1183 = vpow2.f32 %v1017_v56 }
 0x1d0   : > { %v1174_v59 = vpop.eup %1173  ;;  %v730_v60 = vadd.f32 1.0, %v1172_v58  ;;  %1185 = vpow2.f32 %v1018_v57  ;;  %v597_v61 = vpop.f32.mrb[4].mxu1 }
 0x1d1   : > { %v1176_v62 = vpop.eup %1175  ;;  %v731_v63 = vadd.f32 1.0, %v1174_v59  ;;  %v598_v0 = vadd.f32 %v597_v61, %v1453_v34  ;;  %v599_v1 = vpop.f32.mrb[5].mxu1 }
 0x1d2   : > { %v1178_v2 = vpop.eup %1177  ;;  %1187 = vrcp.f32 %v730_v60  ;;  %v732_v3 = vadd.f32 1.0, %v1176_v62  ;;  %v600_v4 = vadd.f32 %v599_v1, %v1455_v35  ;;  %v601_v5 = vpop.f32.mrb[6].mxu1 }
 0x1d3   : > { %1189 = vrcp.f32 %v731_v63  ;;  %v733_v6 = vadd.f32 1.0, %v1178_v2  ;;  %v1019_v7 = vmul.f32 -1.442695, %v598_v0  ;;  %v602_v8 = vadd.f32 %v601_v5, %v1453_v34  ;;  %v603_v9 = vpop.f32.mrb[7].mxu1 }
 0x1d4   : > { %1191 = vrcp.f32 %v732_v3  ;;  %v1020_v10 = vmul.f32 -1.442695, %v600_v4  ;;  %v604_v11 = vadd.f32 %v603_v9, %v1455_v35 }
 0x1d5   : > { %1193 = vrcp.f32 %v733_v6  ;;  %v1021_v12 = vmul.f32 -1.442695, %v602_v8 }
 0x1d6   : > { %1195 = vpow2.f32 %v1019_v7  ;;  %v1022_v13 = vmul.f32 -1.442695, %v604_v11 }
 0x1d7   : > { %v1180_v14 = vpop.eup %1179  ;;  %1197 = vpow2.f32 %v1020_v10 }
 0x1d8   : > { %v1182_v15 = vpop.eup %1181  ;;  %v734_v16 = vadd.f32 1.0, %v1180_v14  ;;  %1199 = vpow2.f32 %v1021_v12  ;;  %v607_v17 = vpop.f32.mrb[8].mxu1 }
 0x1d9   : > { %v1184_v18 = vpop.eup %1183  ;;  %v735_v19 = vadd.f32 1.0, %v1182_v15  ;;  %1201 = vpow2.f32 %v1022_v13  ;;  %v608_v20 = vadd.f32 %v607_v17, %v1453_v34  ;;  %v609_v21 = vpop.f32.mrb[9].mxu1 }
 0x1da   : > { %v1186_v22 = vpop.eup %1185  ;;  %1203 = vrcp.f32 %v734_v16  ;;  %v736_v23 = vadd.f32 1.0, %v1184_v18  ;;  %v610_v24 = vadd.f32 %v609_v21, %v1455_v35  ;;  %v611_v25 = vpop.f32.mrb[10].mxu1 }
 0x1db   : > { %1205 = vrcp.f32 %v735_v19  ;;  %v737_v28 = vadd.f32 1.0, %v1186_v22  ;;  %v1023_v29 = vmul.f32 -1.442695, %v608_v20  ;;  %v612_v30 = vadd.f32 %v611_v25, %v1453_v34  ;;  %v613_v31 = vpop.f32.mrb[11].mxu1 }
 0x1dc   : > { %v1188_v32 = vpop.eup %1187  ;;  %1207 = vrcp.f32 %v736_v23  ;;  %v1024_v33 = vmul.f32 -1.442695, %v610_v24  ;;  %v614_v26 = vadd.f32 %v613_v31, %v1455_v35 }
 0x1dd   : > { %v1190_v27 = vpop.eup %1189  ;;  %1209 = vrcp.f32 %v737_v28  ;;  %v1025_v36 = vmul.f32 -1.442695, %v612_v30 }
 0x1de   : > { %v1192_v37 = vpop.eup %1191  ;;  %v1056_v38 = vpack.c.bf16 %v1190_v27, %v1188_v32  ;;  %1211 = vpow2.f32 %v1023_v29  ;;  %v1026_v39 = vmul.f32 -1.442695, %v614_v26 }
 0x1df   : > { %v1194_v40 = vpop.eup %1193  ;;  %1213 = vpow2.f32 %v1024_v33 }
 0x1e0   : > { %v1196_v41 = vpop.eup %1195  ;;  %898 = vst [vmem:[%s1477_s24] sm:$0xff] %v1056_v38  ;;  %v1057_v42 = vpack.c.bf16 %v1194_v40, %v1192_v37  ;;  %1215 = vpow2.f32 %v1025_v36  ;;  %v617_v43 = vpop.f32.mrb[12].mxu1 }
 0x1e1   : > { %v1198_v44 = vpop.eup %1197  ;;  %v738_v45 = vadd.f32 1.0, %v1196_v41  ;;  %1217 = vpow2.f32 %v1026_v39  ;;  %v618_v46 = vadd.f32 %v617_v43, %v1453_v34  ;;  %v619_v47 = vpop.f32.mrb[13].mxu1 }
 0x1e2   : > { %v1200_v48 = vpop.eup %1199  ;;  %899 = vst [vmem:[%s1477_s24 + $0x8] sm:$0xff] %v1057_v42  ;;  %v739_v49 = vadd.f32 1.0, %v1198_v44  ;;  %v620_v50 = vadd.f32 %v619_v47, %v1455_v35  ;;  %v621_v51 = vpop.f32.mrb[14].mxu1 }
 0x1e3   : > { %v1202_v52 = vpop.eup %1201  ;;  %1219 = vrcp.f32 %v738_v45  ;;  %v740_v53 = vadd.f32 1.0, %v1200_v48  ;;  %v1027_v54 = vmul.f32 -1.442695, %v618_v46  ;;  %v622_v55 = vadd.f32 %v621_v51, %v1453_v34  ;;  %v623_v56 = vpop.f32.mrb[15].mxu1 }
 0x1e4   : > { %v1204_v57 = vpop.eup %1203  ;;  %1221 = vrcp.f32 %v739_v49  ;;  %v741_v58 = vadd.f32 1.0, %v1202_v52  ;;  %v1028_v59 = vmul.f32 -1.442695, %v620_v50  ;;  %v624_v60 = vadd.f32 %v623_v56, %v1455_v35 }
 0x1e5   : > { %v1206_v61 = vpop.eup %1205  ;;  %1223 = vrcp.f32 %v740_v53  ;;  %v1029_v62 = vmul.f32 -1.442695, %v622_v55 }
 0x1e6   : > { %v1208_v63 = vpop.eup %1207  ;;  %v1058_v0 = vpack.c.bf16 %v1206_v61, %v1204_v57  ;;  %1225 = vrcp.f32 %v741_v58  ;;  %v1030_v1 = vmul.f32 -1.442695, %v624_v60 }
 0x1e7   : > { %v1210_v2 = vpop.eup %1209  ;;  %1227 = vpow2.f32 %v1027_v54 }
 0x1e8   : > { %v1212_v3 = vpop.eup %1211  ;;  %900 = vst [vmem:[%s1477_s24 + $0x10] sm:$0xff] %v1058_v0  ;;  %v1059_v4 = vpack.c.bf16 %v1210_v2, %v1208_v63  ;;  %1229 = vpow2.f32 %v1028_v59  ;;  %v627_v5 = vpop.f32.mrb[16].mxu1 }
 0x1e9   : > { %v1214_v6 = vpop.eup %1213  ;;  %v742_v7 = vadd.f32 1.0, %v1212_v3  ;;  %1231 = vpow2.f32 %v1029_v62  ;;  %v628_v8 = vadd.f32 %v627_v5, %v1453_v34  ;;  %v629_v9 = vpop.f32.mrb[17].mxu1 }
 0x1ea   : > { %v1216_v10 = vpop.eup %1215  ;;  %901 = vst [vmem:[%s1477_s24 + $0x18] sm:$0xff] %v1059_v4  ;;  %v743_v11 = vadd.f32 1.0, %v1214_v6  ;;  %1233 = vpow2.f32 %v1030_v1  ;;  %v630_v12 = vadd.f32 %v629_v9, %v1455_v35  ;;  %v631_v13 = vpop.f32.mrb[18].mxu1 }
 0x1eb   : > { %v1218_v14 = vpop.eup %1217  ;;  %1235 = vrcp.f32 %v742_v7  ;;  %v744_v15 = vadd.f32 1.0, %v1216_v10  ;;  %v1031_v16 = vmul.f32 -1.442695, %v628_v8  ;;  %v632_v17 = vadd.f32 %v631_v13, %v1453_v34  ;;  %v633_v18 = vpop.f32.mrb[19].mxu1 }
 0x1ec   : > { %1237 = vrcp.f32 %v743_v11  ;;  %v745_v19 = vadd.f32 1.0, %v1218_v14  ;;  %v1032_v20 = vmul.f32 -1.442695, %v630_v12  ;;  %v634_v21 = vadd.f32 %v633_v18, %v1455_v35 }
 0x1ed   : > { %v1220_v22 = vpop.eup %1219  ;;  %1239 = vrcp.f32 %v744_v15  ;;  %v1033_v23 = vmul.f32 -1.442695, %v632_v17 }
 0x1ee   : > { %v1222_v24 = vpop.eup %1221  ;;  %1241 = vrcp.f32 %v745_v19  ;;  %v1034_v25 = vmul.f32 -1.442695, %v634_v21 }
 0x1ef   : > { %v1224_v28 = vpop.eup %1223  ;;  %v1060_v29 = vpack.c.bf16 %v1222_v24, %v1220_v22  ;;  %1243 = vpow2.f32 %v1031_v16 }
 0x1f0   : > { %v1226_v30 = vpop.eup %1225  ;;  %1245 = vpow2.f32 %v1032_v20  ;;  %v637_v31 = vpop.f32.mrb[20].mxu1 }
 0x1f1   : > { %v1228_v32 = vpop.eup %1227  ;;  %902 = vst [vmem:[%s1477_s24 + $0x20] sm:$0xff] %v1060_v29  ;;  %v1061_v33 = vpack.c.bf16 %v1226_v30, %v1224_v28  ;;  %1247 = vpow2.f32 %v1033_v23  ;;  %v638_v26 = vadd.f32 %v637_v31, %v1453_v34  ;;  %v639_v27 = vpop.f32.mrb[21].mxu1 }
 0x1f2   : > { %v1230_v36 = vpop.eup %1229  ;;  %v746_v37 = vadd.f32 1.0, %v1228_v32  ;;  %1249 = vpow2.f32 %v1034_v25  ;;  %v640_v38 = vadd.f32 %v639_v27, %v1455_v35  ;;  %v641_v39 = vpop.f32.mrb[22].mxu1 }
 0x1f3   : > { %v1232_v40 = vpop.eup %1231  ;;  %903 = vst [vmem:[%s1477_s24 + $0x28] sm:$0xff] %v1061_v33  ;;  %v747_v41 = vadd.f32 1.0, %v1230_v36  ;;  %v642_v42 = vadd.f32 %v641_v39, %v1453_v34  ;;  %v643_v43 = vpop.f32.mrb[23].mxu1  ;;  %v1035_v46 = vmul.f32 -1.442695, %v638_v26 }
 0x1f4   : > { %v1234_v44 = vpop.eup %1233  ;;  %1251 = vrcp.f32 %v746_v37  ;;  %v748_v45 = vadd.f32 1.0, %v1232_v40  ;;  %v644_v47 = vadd.f32 %v643_v43, %v1455_v35  ;;  %v1036_v50 = vmul.f32 -1.442695, %v640_v38 }
 0x1f5   : > { %v1236_v48 = vpop.eup %1235  ;;  %1253 = vrcp.f32 %v747_v41  ;;  %v749_v49 = vadd.f32 1.0, %v1234_v44  ;;  %v1037_v52 = vmul.f32 -1.442695, %v642_v42 }
 0x1f6   : > { %v1238_v51 = vpop.eup %1237  ;;  %1255 = vrcp.f32 %v748_v45  ;;  %v1038_v34 = vmul.f32 -1.442695, %v644_v47 }
 0x1f7   : > { %v1240_v53 = vpop.eup %1239  ;;  %v1062_v54 = vpack.c.bf16 %v1238_v51, %v1236_v48  ;;  %1257 = vrcp.f32 %v749_v49 }
 0x1f8   : > { %v1242_v55 = vpop.eup %1241  ;;  %1259 = vpow2.f32 %v1035_v46 }
 0x1f9   : > { %v1244_v56 = vpop.eup %1243  ;;  %904 = vst [vmem:[%s1477_s24 + $0x30] sm:$0xff] %v1062_v54  ;;  %v1063_v57 = vpack.c.bf16 %v1242_v55, %v1240_v53  ;;  %1261 = vpow2.f32 %v1036_v50 }
 0x1fa   : > { %v1246_v58 = vpop.eup %1245  ;;  %v750_v35 = vadd.f32 1.0, %v1244_v56  ;;  %1263 = vpow2.f32 %v1037_v52 }
 0x1fb   : > { %v1248_v59 = vpop.eup %1247  ;;  %905 = vst [vmem:[%s1477_s24 + $0x38] sm:$0xff] %v1063_v57  ;;  %v751_v60 = vadd.f32 1.0, %v1246_v58  ;;  %1265 = vpow2.f32 %v1038_v34 }
 0x1fc   : > { %v1250_v61 = vpop.eup %1249  ;;  %1267 = vrcp.f32 %v750_v35  ;;  %v752_v62 = vadd.f32 1.0, %v1248_v59 }
 0x1fd   : > { %1269 = vrcp.f32 %v751_v60  ;;  %v753_v63 = vadd.f32 1.0, %v1250_v61 }
 0x1fe   : > { %v1252_v0 = vpop.eup %1251  ;;  %1271 = vrcp.f32 %v752_v62 }
 0x1ff   : > { %v1254_v1 = vpop.eup %1253  ;;  %1273 = vrcp.f32 %v753_v63 }
 0x200   : > { %v1256_v2 = vpop.eup %1255  ;;  %v1064_v3 = vpack.c.bf16 %v1254_v1, %v1252_v0 }
 0x201   : > { %v1258_v4 = vpop.eup %1257 }
 0x202   : > { %v1260_v5 = vpop.eup %1259  ;;  %906 = vst [vmem:[%s1477_s24 + $0x40] sm:$0xff] %v1064_v3  ;;  %v1065_v6 = vpack.c.bf16 %v1258_v4, %v1256_v2 }
 0x203   : > { %v1262_v7 = vpop.eup %1261  ;;  %v754_v8 = vadd.f32 1.0, %v1260_v5 }
 0x204   : > { %v1264_v9 = vpop.eup %1263  ;;  %907 = vst [vmem:[%s1477_s24 + $0x48] sm:$0xff] %v1065_v6  ;;  %v755_v10 = vadd.f32 1.0, %v1262_v7 }
 0x205   : > { %v1266_v11 = vpop.eup %1265  ;;  %1275 = vrcp.f32 %v754_v8  ;;  %v756_v12 = vadd.f32 1.0, %v1264_v9 }
 0x206   : > { %v1268_v13 = vpop.eup %1267  ;;  %1277 = vrcp.f32 %v755_v10  ;;  %v757_v14 = vadd.f32 1.0, %v1266_v11 }
 0x207   : > { %v1270_v15 = vpop.eup %1269  ;;  %1279 = vrcp.f32 %v756_v12 }
 0x208   : > { %v1272_v16 = vpop.eup %1271  ;;  %v1066_v17 = vpack.c.bf16 %v1270_v15, %v1268_v13  ;;  %1281 = vrcp.f32 %v757_v14 }
 0x209   : > { %v1274_v18 = vpop.eup %1273 }
 0x20a   : > { %908 = vst [vmem:[%s1477_s24 + $0x50] sm:$0xff] %v1066_v17  ;;  %v1067_v19 = vpack.c.bf16 %v1274_v18, %v1272_v16 }
 0x20c   : > { %909 = vst [vmem:[%s1477_s24 + $0x58] sm:$0xff] %v1067_v19 }
 0x20f   : > { %v1276_v20 = vpop.eup %1275 }
 0x210   : > { %v1278_v21 = vpop.eup %1277 }
 0x211   : > { %v1280_v22 = vpop.eup %1279  ;;  %v1068_v23 = vpack.c.bf16 %v1278_v21, %v1276_v20 }
 0x212   : > { %v1282_v24 = vpop.eup %1281 }
 0x213   : > { %910 = vst [vmem:[%s1477_s24 + $0x60] sm:$0xff] %v1068_v23  ;;  %v1069_v25 = vpack.c.bf16 %v1282_v24, %v1280_v22 }
 0x215   : > { %911 = vst [vmem:[%s1477_s24 + $0x68] sm:$0xff] %v1069_v25 }
 0x216 PF: > { %s15_s18 = sadd.s32 1, %s1289_s18  }
 0x217   : > { %p12_p4 = scmp.ge.s32.totalorder %s15_s18, 4  }
 0x219   :  { %14 = sbr.rel (!%p12_p4) target bundleno = 1 (0x1), region = 70 }

</bundles_post_ra>
